<compile_context>
chip_gen: v7x
topology: tpu7x:2x2x1
jax: 0.10.0
libtpu: 0.0.40
codegen_flags: <defaults>
</compile_context>

<pallas_src>
import functools

import jax
import jax.numpy as jnp
from jax.experimental import pallas as pl
from jax.experimental.pallas import tpu as pltpu

FEAT_PER_NET = 256            # each sub-net emits 256 features -> concat = 512
FC_IN = 2 * FEAT_PER_NET      # 512
FC_OUT = 27                   # nn.Linear(512, 27)
FC_OUT_PAD = 128              # lane-dense padded output width
LEAKY_SLOPE = 0.01            # F.leaky_relu default negative_slope
NEG_BIG = -1e30               # "−inf" for masked pad lanes (avoids inf/NaN math)


def _round_up(x, m):
    return ((x + m - 1) // m) * m


def _cdiv(a, b):
    return (a + b - 1) // b


def mixture_kernel(x_ref, w12_ref, b12_ref, wfc_ref, bfc_ref,
                   out_ref, acc_ref, *, inv_hw, hw, ts, mask_tail):
    """Grid = (batch_tiles, spatial_tiles); spatial is the (innermost) reduction axis."""
    s = pl.program_id(1)

    # ---- init the (TB, C) pooled accumulator at the first spatial step -------
    @pl.when(s == 0)
    def _():
        acc_ref[...] = jnp.zeros_like(acc_ref)

    # ---- per-tile partial pooling: upcast + (optional tail mask) + XLU reduce.
    # The kernel is DMA-bound, so the VPU mask and XLU reduce hide under the
    # x DMA; accumulating into a (TB, C) scratch instead of (TB, C, TS) frees a
    # full tile of VMEM for larger tiles.
    x = x_ref[...].astype(jnp.float32)                       # (TB, C, TS)
    if mask_tail:
        col = jax.lax.broadcasted_iota(jnp.int32, (1, 1, ts), 2) + s * ts
        x = jnp.where(col < hw, x, 0.0)
    acc_ref[...] += jnp.sum(x, axis=-1)                      # (TB, C)

    # ---- finalize at the last spatial step ------------------------------------
    @pl.when(s == pl.num_programs(1) - 1)
    def _():
        pooled = acc_ref[...] * inv_hw                       # mean over true H*W

        # fused sub-nets: one dot instead of two + concat
        feat = jnp.dot(pooled, w12_ref[...],
                       preferred_element_type=jnp.float32) + b12_ref[...]
        feat = jnp.maximum(feat, 0.0)                        # (TB, 512)

        # PoseNetMixture.forward: fc -> leaky_relu -> log_softmax(dim=1)
        logits = jnp.dot(feat, wfc_ref[...],
                         preferred_element_type=jnp.float32) + bfc_ref[...]
        act = jnp.where(logits > 0, logits, LEAKY_SLOPE * logits)  # (TB, 128)

        # mask the pad lanes (>= 27) so they don't perturb max / logsumexp
        col = jax.lax.broadcasted_iota(jnp.int32, act.shape, 1)
        act = jnp.where(col < FC_OUT, act, NEG_BIG)

        m = jnp.max(act, axis=1, keepdims=True)
        z = act - m
        lse = jnp.log(jnp.sum(jnp.exp(z), axis=1, keepdims=True))
        out_ref[...] = z - lse

    # TODO(synk): `self.size = self.nets[0].size` is python-side attribute
    # bookkeeping with no tensor compute; not represented in the kernel.


def init_params(key, in_channels):
    k1, k2, k3, k4, k5, k6 = jax.random.split(key, 6)
    # PyTorch nn.Linear stores weight as (out, in).
    w1 = jax.random.normal(k1, (FEAT_PER_NET, in_channels), jnp.float32) * 0.05
    b1 = jax.random.normal(k2, (FEAT_PER_NET,), jnp.float32) * 0.05
    w2 = jax.random.normal(k3, (FEAT_PER_NET, in_channels), jnp.float32) * 0.05
    b2 = jax.random.normal(k4, (FEAT_PER_NET,), jnp.float32) * 0.05
    wfc = jax.random.normal(k5, (FC_OUT, FC_IN), jnp.float32) * 0.05
    bfc = jax.random.normal(k6, (FC_OUT,), jnp.float32) * 0.05
    return dict(w1=w1, b1=b1, w2=w2, b2=b2, wfc=wfc, bfc=bfc)


def prepare_params(params):
    """One-time param prep: transpose, fuse sub-net weights, pad fc to 128 lanes."""
    w12 = jnp.concatenate([params["w1"].T, params["w2"].T], axis=1)   # (C, 512)
    b12 = jnp.concatenate([params["b1"], params["b2"]]).reshape(1, FC_IN)
    wfc_pad = jnp.zeros((FC_IN, FC_OUT_PAD), jnp.float32)
    wfc_pad = wfc_pad.at[:, :FC_OUT].set(params["wfc"].T)             # (512, 128)
    bfc_pad = jnp.zeros((1, FC_OUT_PAD), jnp.float32)
    bfc_pad = bfc_pad.at[:, :FC_OUT].set(params["bfc"])               # (1, 128)
    return dict(w12=w12, b12=b12, wfc=wfc_pad, bfc=bfc_pad)


def _vmem_budget_bytes():
    """~75% of physical VMEM: ~96 MiB on v5e/v6e (128 MiB), ~48 MiB on v7x (64 MiB)."""
    cap = 64 * 1024 * 1024
    try:
        info = pltpu.get_tpu_info()
        cap = int(getattr(info, "vmem_capacity_bytes", 0)) or cap
    except Exception:
        pass
    return (3 * cap) // 4


def _choose_tiles(B, C, HW, x_itemsize, budget):
    # ---- batch tile (sublane-ish axis of the output block) -------------------
    if B <= 8:
        TB = B                              # block == full dim; no 8-multiple needed
    else:
        TB = min(128, _round_up(B, 8))
        if _cdiv(B, TB) < 2:                # v7x: keep >=2 programs on the parallel
            TB = max(8, _round_up(_cdiv(B, 2), 8))   # axis so both TCs get work

    # fixed VMEM residents: fused weights + biases + output block + pooled acc
    # (counted double-buffered to be safe)
    def fixed_bytes(tb):
        return (2 * 4 * (C * FC_IN + FC_IN + FC_IN * FC_OUT_PAD + FC_OUT_PAD)
                + 2 * 4 * tb * FC_OUT_PAD + 4 * tb * C)

    # shrink TB if even a 128-lane, double-buffered x tile would not fit (huge C)
    while TB > 8 and 2 * TB * C * 128 * x_itemsize + fixed_bytes(TB) > budget:
        TB = max(8, _round_up(TB // 2, 8))

    # ---- spatial tile (lane axis) --------------------------------------------
    if HW <= 128:
        return TB, HW                       # block == full dim
    avail = max(budget - fixed_bytes(TB), 2 * TB * C * 128 * x_itemsize)
    TS = (avail // (2 * TB * C * x_itemsize)) // 128 * 128
    TS = max(128, min(TS, _round_up(HW, 128)))
    return TB, TS


def posenet_mixture_forward(x_nchw, prepped, *, tb=None, ts=None):
    B, C, H, W = x_nchw.shape
    HW = H * W
    # zero-cost contiguous reshape; native dtype is streamed (kernel upcasts)
    x_flat = x_nchw.reshape(B, C, HW)
    x_itemsize = x_flat.dtype.itemsize

    budget = _vmem_budget_bytes()
    TB_auto, TS_auto = _choose_tiles(B, C, HW, x_itemsize, budget)
    TB = tb if tb is not None else TB_auto
    TS = ts if ts is not None else TS_auto

    grid = (_cdiv(B, TB), _cdiv(HW, TS))
    mask_tail = (HW % TS) != 0

    kernel = functools.partial(mixture_kernel, inv_hw=1.0 / float(HW),
                               hw=HW, ts=TS, mask_tail=mask_tail)

    # advisory cost hint so XLA schedules surrounding ops around this
    # long-running, HBM-bound custom call
    w_bytes = 4 * (C * FC_IN + FC_IN + FC_IN * FC_OUT_PAD + FC_OUT_PAD)
    cost = pl.CostEstimate(
        flops=int(2 * B * C * HW + 2 * B * C * FC_IN + 2 * B * FC_IN * FC_OUT_PAD),
        transcendentals=int(B * (FC_OUT_PAD + 1)),
        bytes_accessed=int(B * C * HW * x_itemsize + B * FC_OUT_PAD * 4 + w_bytes),
    )

    out = pl.pallas_call(
        kernel,
        out_shape=jax.ShapeDtypeStruct((B, FC_OUT_PAD), jnp.float32),
        grid_spec=pltpu.PrefetchScalarGridSpec(
            num_scalar_prefetch=0,
            grid=grid,
            in_specs=[
                # x: tiled over (batch, spatial); auto double-buffered by Pallas
                pl.BlockSpec((TB, C, TS), lambda i, s: (i, 0, s)),
                # weights / biases: constant block index -> stay resident
                pl.BlockSpec((C, FC_IN), lambda i, s: (0, 0)),
                pl.BlockSpec((1, FC_IN), lambda i, s: (0, 0)),
                pl.BlockSpec((FC_IN, FC_OUT_PAD), lambda i, s: (0, 0)),
                pl.BlockSpec((1, FC_OUT_PAD), lambda i, s: (0, 0)),
            ],
            out_specs=pl.BlockSpec((TB, FC_OUT_PAD), lambda i, s: (i, 0)),
            # pooled accumulator only: (TB, C), not a full (TB, C, TS) tile
            scratch_shapes=[pltpu.VMEM((TB, C), jnp.float32)],
        ),
        compiler_params=pltpu.CompilerParams(
            dimension_semantics=("parallel", "arbitrary"),
            vmem_limit_bytes=int(budget),
        ),
        cost_estimate=cost,
    )(x_flat, prepped["w12"], prepped["b12"], prepped["wfc"], prepped["bfc"])

    return out[:, :FC_OUT]


def reference_forward(x_nchw, params):
    # pure-JAX reference of the same semantics
    B, C, H, W = x_nchw.shape
    pooled = jnp.mean(x_nchw.astype(jnp.float32).reshape(B, C, H * W), axis=-1)
    f1 = jnp.maximum(pooled @ params["w1"].T + params["b1"], 0.0)
    f2 = jnp.maximum(pooled @ params["w2"].T + params["b2"], 0.0)
    feat = jnp.concatenate([f1, f2], axis=1)
    logits = feat @ params["wfc"].T + params["bfc"]
    act = jnp.where(logits > 0, logits, LEAKY_SLOPE * logits)
    return jax.nn.log_softmax(act, axis=1)


if __name__ == "__main__":
    key = jax.random.PRNGKey(0)
    kx, kp = jax.random.split(key)

    B, C, H, W = 2, 4, 16, 16
    x = jax.random.normal(kx, (B, C, H, W), jnp.float32)
    params = init_params(kp, C)
    prepped = prepare_params(params)

    # ts=128 forces a 2-step spatial reduction so the accumulator path is
    # exercised even at this small test shape.
    out = posenet_mixture_forward(x, prepped, ts=128)
    out = jax.block_until_ready(out)
    ref = reference_forward(x, params)
    assert out.shape == (B, FC_OUT)
    assert jnp.allclose(out, ref, atol=1e-5, rtol=1e-5), "mismatch vs reference"

    # ragged spatial extent (H*W = 300, not a multiple of TS=128): exercises the
    # in-kernel tail masking that replaced the wrapper-side jnp.pad.
    x2 = jax.random.normal(kx, (B, C, 15, 20), jnp.float32)
    out2 = jax.block_until_ready(posenet_mixture_forward(x2, prepped, ts=128))
    ref2 = reference_forward(x2, params)
    assert jnp.allclose(out2, ref2, atol=1e-5, rtol=1e-5), "ragged-tail mismatch"

    print("KERNEL_OK")
</pallas_src>

<mosaic_0001>
module attributes {stable_mosaic.version = 11 : i64} {
  func.func @mixture_kernel(%arg0: i32, %arg1: i32, %arg2: memref<2x4x128xf32, #tpu.memory_space<vmem>>, %arg3: memref<4x512xf32, #tpu.memory_space<vmem>>, %arg4: memref<1x512xf32, #tpu.memory_space<vmem>>, %arg5: memref<512x128xf32, #tpu.memory_space<vmem>>, %arg6: memref<1x128xf32, #tpu.memory_space<vmem>>, %arg7: memref<2x128xf32, #tpu.memory_space<vmem>>, %arg8: memref<2x4xf32, #tpu.memory_space<vmem>>) attributes {dimension_semantics = [#tpu.dimension_semantics<parallel>, #tpu.dimension_semantics<arbitrary>], iteration_bounds = array<i64: 1, 2>, scalar_prefetch = 0 : i64, scratch_operands = 1 : i64, tpu.core_type = #tpu.core_type<tc>, window_params = [{transform_indices = @transform_0, window_bounds = array<i64: 2, 4, 128>}, {pipeline_mode = #tpu.pipeline_mode<synchronous>, transform_indices = @transform_1, window_bounds = array<i64: 4, 512>}, {pipeline_mode = #tpu.pipeline_mode<synchronous>, transform_indices = @transform_2, window_bounds = array<i64: 1, 512>}, {pipeline_mode = #tpu.pipeline_mode<synchronous>, transform_indices = @transform_3, window_bounds = array<i64: 512, 128>}, {pipeline_mode = #tpu.pipeline_mode<synchronous>, transform_indices = @transform_4, window_bounds = array<i64: 1, 128>}, {transform_indices = @transform_5, window_bounds = array<i64: 2, 128>}]} {
    %c0_i32 = arith.constant 0 : i32
    %0 = arith.cmpi eq, %arg1, %c0_i32 : i32
    %1 = arith.extui %0 : i1 to i32
    %c0_i32_0 = arith.constant 0 : i32
    %2 = arith.cmpi ne, %1, %c0_i32_0 : i32
    scf.if %2 {
      %cst_8 = arith.constant 0.000000e+00 : f32
      %11 = vector.broadcast %cst_8 : f32 to vector<2x4xf32>
      %c0_9 = arith.constant 0 : index
      %c0_10 = arith.constant 0 : index
      %12 = vector.load %arg8[%c0_9, %c0_10] : memref<2x4xf32, #tpu.memory_space<vmem>>, vector<2x4xf32>
      tpu.vector_store %arg8[%c0_9, %c0_10], %11 {strides = array<i32>} : memref<2x4xf32, #tpu.memory_space<vmem>>, vector<2x4xf32>,
    } else {
    }
    %c0 = arith.constant 0 : index
    %c0_1 = arith.constant 0 : index
    %c0_2 = arith.constant 0 : index
    %3 = vector.load %arg2[%c0, %c0_1, %c0_2] : memref<2x4x128xf32, #tpu.memory_space<vmem>>, vector<2x4x128xf32>
    %c0_3 = arith.constant 0 : index
    %c0_4 = arith.constant 0 : index
    %4 = vector.load %arg8[%c0_3, %c0_4] : memref<2x4xf32, #tpu.memory_space<vmem>>, vector<2x4xf32>
    %cst = arith.constant dense<0.000000e+00> : vector<2x4xf32>
    %5 = vector.multi_reduction <add>, %3, %cst [2] : vector<2x4x128xf32> to vector<2x4xf32>
    %6 = arith.addf %4, %5 : vector<2x4xf32>
    %c0_5 = arith.constant 0 : index
    %c0_6 = arith.constant 0 : index
    %7 = vector.load %arg8[%c0_5, %c0_6] : memref<2x4xf32, #tpu.memory_space<vmem>>, vector<2x4xf32>
    tpu.vector_store %arg8[%c0_5, %c0_6], %6 {strides = array<i32>} : memref<2x4xf32, #tpu.memory_space<vmem>>, vector<2x4xf32>,
    %c1_i32 = arith.constant 1 : i32
    %8 = arith.cmpi eq, %arg1, %c1_i32 : i32
    %9 = arith.extui %8 : i1 to i32
    %c0_i32_7 = arith.constant 0 : i32
    %10 = arith.cmpi ne, %9, %c0_i32_7 : i32
    scf.if %10 {
      %c0_8 = arith.constant 0 : index
      %c0_9 = arith.constant 0 : index
      %11 = vector.load %arg8[%c0_8, %c0_9] : memref<2x4xf32, #tpu.memory_space<vmem>>, vector<2x4xf32>
      %cst_10 = arith.constant 3.906250e-03 : f32
      %12 = vector.broadcast %cst_10 : f32 to vector<2x4xf32>
      %13 = arith.mulf %11, %12 : vector<2x4xf32>
      %c0_11 = arith.constant 0 : index
      %c0_12 = arith.constant 0 : index
      %14 = vector.load %arg3[%c0_11, %c0_12] : memref<4x512xf32, #tpu.memory_space<vmem>>, vector<4x512xf32>
      %cst_13 = arith.constant dense<0.000000e+00> : vector<2x512xf32>
      %15 = tpu.matmul %13, %14, %cst_13 {dimension_numbers = #tpu.dot_dimension_numbers<[1], [0], [0], [1], [0, 0, 1, 1], [], []>} : vector<2x4xf32>, vector<4x512xf32>, vector<2x512xf32> -> vector<2x512xf32>
      %c0_14 = arith.constant 0 : index
      %c0_15 = arith.constant 0 : index
      %16 = vector.load %arg4[%c0_14, %c0_15] : memref<1x512xf32, #tpu.memory_space<vmem>>, vector<1x512xf32>
      %17 = vector.broadcast %16 : vector<1x512xf32> to vector<2x512xf32>
      %18 = arith.addf %15, %17 : vector<2x512xf32>
      %cst_16 = arith.constant 0.000000e+00 : f32
      %19 = vector.broadcast %cst_16 : f32 to vector<2x512xf32>
      %20 = arith.maximumf %18, %19 : vector<2x512xf32>
      %c0_17 = arith.constant 0 : index
      %c0_18 = arith.constant 0 : index
      %21 = vector.load %arg5[%c0_17, %c0_18] : memref<512x128xf32, #tpu.memory_space<vmem>>, vector<512x128xf32>
      %cst_19 = arith.constant dense<0.000000e+00> : vector<2x128xf32>
      %22 = tpu.matmul %20, %21, %cst_19 {dimension_numbers = #tpu.dot_dimension_numbers<[1], [0], [0], [1], [0, 0, 1, 1], [], []>} : vector<2x512xf32>, vector<512x128xf32>, vector<2x128xf32> -> vector<2x128xf32>
      %c0_20 = arith.constant 0 : index
      %c0_21 = arith.constant 0 : index
      %23 = vector.load %arg6[%c0_20, %c0_21] : memref<1x128xf32, #tpu.memory_space<vmem>>, vector<1x128xf32>
      %24 = vector.broadcast %23 : vector<1x128xf32> to vector<2x128xf32>
      %25 = arith.addf %22, %24 : vector<2x128xf32>
      %cst_22 = arith.constant 0.000000e+00 : f32
      %26 = vector.broadcast %cst_22 : f32 to vector<2x128xf32>
      %27 = arith.cmpf ogt, %25, %26 : vector<2x128xf32>
      %cst_23 = arith.constant 0.00999999977 : f32
      %28 = vector.broadcast %cst_23 : f32 to vector<2x128xf32>
      %29 = arith.mulf %28, %25 : vector<2x128xf32>
      %30 = arith.select %27, %25, %29 : vector<2x128xi1>, vector<2x128xf32>
      %31 = tpu.iota {dimensions = array<i32: 1>} : vector<2x128xi32>
      %c27_i32 = arith.constant 27 : i32
      %32 = vector.broadcast %c27_i32 : i32 to vector<2x128xi32>
      %33 = arith.cmpi slt, %31, %32 : vector<2x128xi32>
      %cst_24 = arith.constant -1.000000e+30 : f32
      %34 = vector.broadcast %cst_24 : f32 to vector<2x128xf32>
      %35 = arith.select %33, %30, %34 : vector<2x128xi1>, vector<2x128xf32>
      %cst_25 = arith.constant dense<0xFF800000> : vector<2xf32>
      %36 = vector.multi_reduction <maximumf>, %35, %cst_25 [1] : vector<2x128xf32> to vector<2xf32>
      %37 = vector.shape_cast %36 : vector<2xf32> to vector<2x1xf32>
      %38 = vector.broadcast %37 : vector<2x1xf32> to vector<2x128xf32>
      %39 = arith.subf %35, %38 : vector<2x128xf32>
      %40 = math.exp %39 : vector<2x128xf32>
      %cst_26 = arith.constant dense<0.000000e+00> : vector<2xf32>
      %41 = vector.multi_reduction <add>, %40, %cst_26 [1] : vector<2x128xf32> to vector<2xf32>
      %42 = vector.shape_cast %41 : vector<2xf32> to vector<2x1xf32>
      %43 = math.log %42 : vector<2x1xf32>
      %44 = vector.broadcast %43 : vector<2x1xf32> to vector<2x128xf32>
      %45 = arith.subf %39, %44 : vector<2x128xf32>
      %c0_27 = arith.constant 0 : index
      %c0_28 = arith.constant 0 : index
      %46 = vector.load %arg7[%c0_27, %c0_28] : memref<2x128xf32, #tpu.memory_space<vmem>>, vector<2x128xf32>
      tpu.vector_store %arg7[%c0_27, %c0_28], %45 {strides = array<i32>} : memref<2x128xf32, #tpu.memory_space<vmem>>, vector<2x128xf32>,
    } else {
    }
    return
  }
  func.func @transform_0(%arg0: i32, %arg1: i32) -> (i32, i32, i32) {
    %c0_i32 = arith.constant 0 : i32
    %c0_i32_0 = arith.constant 0 : i32
    return %arg0, %c0_i32, %arg1 : i32, i32, i32
  }
  func.func @transform_1(%arg0: i32, %arg1: i32) -> (i32, i32) {
    %c0_i32 = arith.constant 0 : i32
    %c0_i32_0 = arith.constant 0 : i32
    %c0_i32_1 = arith.constant 0 : i32
    return %c0_i32, %c0_i32_0 : i32, i32
  }
  func.func @transform_2(%arg0: i32, %arg1: i32) -> (i32, i32) {
    %c0_i32 = arith.constant 0 : i32
    %c0_i32_0 = arith.constant 0 : i32
    %c0_i32_1 = arith.constant 0 : i32
    return %c0_i32, %c0_i32_0 : i32, i32
  }
  func.func @transform_3(%arg0: i32, %arg1: i32) -> (i32, i32) {
    %c0_i32 = arith.constant 0 : i32
    %c0_i32_0 = arith.constant 0 : i32
    %c0_i32_1 = arith.constant 0 : i32
    return %c0_i32, %c0_i32_0 : i32, i32
  }
  func.func @transform_4(%arg0: i32, %arg1: i32) -> (i32, i32) {
    %c0_i32 = arith.constant 0 : i32
    %c0_i32_0 = arith.constant 0 : i32
    %c0_i32_1 = arith.constant 0 : i32
    return %c0_i32, %c0_i32_0 : i32, i32
  }
  func.func @transform_5(%arg0: i32, %arg1: i32) -> (i32, i32) {
    %c0_i32 = arith.constant 0 : i32
    %c0_i32_0 = arith.constant 0 : i32
    return %arg0, %c0_i32 : i32, i32
  }
}

</mosaic_0001>

<bundles_post_ra>
// kernel: tpu_custom_call.1
= control target key start
LH: loop header
LB: loop body
LE: loop exit
PB: predicated region body
PF: predicated region fallthrough
CT: control target
= control target key end

     0   :  { %10 = vsyncpa [#allocation4], 0  ;;  %s1533_s0 = inlined_call_operand.hbm [shape: f32[2,4,256], index: 0, kind: input, shape index: {}]   ;;  %s1534_s1 = inlined_call_operand.hbm [shape: f32[4,512], index: 1, kind: input, shape index: {}]   ;;  %s1535_s2 = inlined_call_operand.vmem [shape: f32[1,512], index: 2, kind: input, shape index: {}]   ;;  %s1536_s3 = inlined_call_operand.hbm [shape: f32[512,128], index: 3, kind: input, shape index: {}]   ;;  %s1537_s4 = inlined_call_operand.vmem [shape: f32[1,128], index: 4, kind: input, shape index: {}]   ;;  %s1538_s5 = inlined_call_operand.hbm [shape: f32[2,128], index: 5, kind: output, shape index: {}]  }
   0x1   :  { %12 = vsyncpa [#allocation4 + $0x1], 0 }
   0x2   :  { %13 = vsyncpa [#allocation7], 0 }
   0x3   :  { %14 = vsyncpa [#allocation5], 0  ;;  %s1292_s18 = smov 0   ;;  %s1294_s19 = smov 0  }
   0x4   :  { %s1296_s20 = smov 0   ;;  %s1298_s21 = smov 0  }
   0x5   :  { %s1300_s22 = smov 0   ;;  %s1302_s23 = smov 0  }
   0x6 LB: > { %s827_s24 = sadd.s32 4294967295, %s1250_s23   ;;  %s41_s25 = sadd.s32 1, %s1238_s20  ;;  %s1250_s23 = sphi %s1302_s23, %s20_s23   ;;  %s1246_s22 = sphi %s1300_s22, %s1558_s22   ;;  %s1242_s21 = sphi %s1298_s21, %s1557_s21   ;;  %s1238_s20 = sphi %s1296_s20, %s1556_s20   ;;  %s1234_s19 = sphi %s1294_s19, %s1555_s19   ;;  %s1230_s18 = sphi %s1292_s18, %s1554_s18  }
   0x7   : > { %p48_p0 = scmp.ne.s32.totalorder %s1238_s20, %s1234_s19  ;;  %p49_p1 = scmp.eq.s32.totalorder %s1250_s23, 0 }
   0x8   : > { %p54_p2 = scmp.ne.s32.totalorder %s1234_s19, %s1230_s18  ;;  %p1328_p3 = scmp.eq.s32.totalorder %s827_s24, 0 }
   0x9   : > { %p50_p4 = por %p49_p1, %p48_p0  ;;  %p828_p5 = scmp.ge.s32.totalorder %s1250_s23, 1 }
   0xa   : > { %s1544_s26 = scalar_select %p1328_p3, 1, 0 }
   0xb   : > { %p1335_p6 = por %p1328_p3, %p54_p2  ;;  %p175_p7 = scmp.lt.s32.totalorder %s1250_s23, 3 }
   0xc   : > { %s1252_s29 = smov [#allocation6]   ;;  %p1012_p10 = scmp.lt.s32.totalorder %s1250_s23, 2 }
   0xd   : > { %s1545_s27 = scalar_select %p1335_p6, 1, 0 }
   0xe   : > { %p1340_p8 = pnand %p828_p5, %p175_p7  ;;  %s188_s30 = sshll.u32 %s1252_s29, 4  ;;  %s189_s30 = int_to_ptr.vmem [resolvable:$true] %s188_s30 }
   0xf   : > { %p1353_p12 = pnand %p1012_p10, %p50_p4  ;;  %s1253_s8 = smov [#allocation8]  }
  0x10   : > { %s1546_s28 = scalar_select %p1340_p8, 1, 0 }
  0x11   : > { %p999_p9 = pneg %p1340_p8  ;;  %s201_s9 = sshll.u32 %s1253_s8, 4  ;;  %s202_s9 = int_to_ptr.vmem [resolvable:$true] %s201_s9 }
  0x12   : > { %s1548_s7 = scalar_select %p1353_p12, 1, 0 }
  0x13   : > { %p1349_p11 = pnand %p999_p9, %p1328_p3  ;;  %s1080_s12 = scalar_lea.hbm %s1534_s1, 256 }
  0x14   : > { %p1081_p13 = scmp.ne.s32.totalorder %s1534_s1, %s1080_s12  ;;  %p1087_p4 = scmp.lt.u32.totalorder %s1080_s12, %s1534_s1 }
  0x15   : > { %p1082_p0 = pneg %p1349_p11 }
  0x17   : > { %p1083_p1 = pnand %p1082_p0, %p1081_p13 }
  0x19   : > { %p1084_p2 = pneg %p1083_p1 }
  0x1b   : > { %p1089_p5 = pnand %p1087_p4, %p1084_p2 }
  0x1d   : > { %1092 = shalt.err (!%p1089_p5)
}
  0x1e   : > { %s1093_s17 = scalar_lea.vmem %s189_s30, 256  ;;  %p1101_p3 = scmp.lt.s32.totalorder %s189_s30, %s189_s30 }
  0x1f   : > { %p1094_p7 = scmp.ne.s32.totalorder %s189_s30, %s1093_s17  ;;  %p1102_p6 = scmp.lt.s32.totalorder %s1093_s17, %s1093_s17 }
  0x21   : > { %p1096_p9 = pnand %p1094_p7, %p1082_p0  ;;  %p1103_p8 = por %p1102_p6, %p1101_p3 }
  0x23   : > { %p1097_p10 = pneg %p1096_p9 }
  0x25   : > { %p1104_p12 = pnand %p1103_p8, %p1097_p10 }
  0x27   : > { %1107 = shalt.err (!%p1104_p12)
}
  0x28   : > { %1002 = dma.hbm_to_vmem [thread:$0]  (!%p1349_p11), %s1534_s1, 256, %s189_s30, [#allocation7]  }
  0x29   : > { %s1108_s11 = scalar_lea.hbm %s1536_s3, 8192 }
  0x2a   : > { %p1109_p13 = scmp.ne.s32.totalorder %s1536_s3, %s1108_s11  ;;  %p1115_p8 = scmp.lt.u32.totalorder %s1108_s11, %s1536_s3 }
  0x2c   : > { %p1111_p3 = pnand %p1109_p13, %p1082_p0 }
  0x2e   : > { %p1112_p6 = pneg %p1111_p3 }
  0x30   : > { %p1117_p12 = pnand %p1115_p8, %p1112_p6 }
  0x32   : > { %1120 = shalt.err (!%p1117_p12)
}
  0x33   : > { %s1121_s30 = scalar_lea.vmem %s202_s9, 8192  ;;  %p1129_p5 = scmp.lt.s32.totalorder %s202_s9, %s202_s9 }
  0x34   : > { %p1122_p1 = scmp.ne.s32.totalorder %s202_s9, %s1121_s30  ;;  %p1130_p7 = scmp.lt.s32.totalorder %s1121_s30, %s1121_s30 }
  0x36   : > { %p1124_p2 = pnand %p1122_p1, %p1082_p0  ;;  %p1131_p9 = por %p1130_p7, %p1129_p5 }
  0x38   : > { %p1125_p4 = pneg %p1124_p2 }
  0x3a   : > { %p1132_p10 = pnand %p1131_p9, %p1125_p4 }
  0x3c   : > { %1135 = shalt.err (!%p1132_p10)
}
  0x3d   : > { %s1254_s16 = smov 128   ;;  %s1255_s17 = smov 8  }
  0x3e   : > { %1005 = dma.hbm_to_vmem [thread:$0]  (!%p1349_p11), %s1536_s3, 8192, %s202_s9, [#allocation7], %s1254_s16, %s1254_s16, %s1255_s17  }
  0x3f   : > { %s218_s8 = sand.u32 1, %s1238_s20   ;;  %s29_s10 = sadd.s32 1, %s1246_s22 }
  0x40   : > { %p30_p0 = scmp.ge.s32.totalorder %s29_s10, 2  ;;  %s832_s11 = sshll.u32 %s218_s8, 3 }
  0x41   : > { %s833_s12 = sshll.u32 %s1246_s22, 6  ;;  %s222_s15 = scalar_lea.vmem [#allocation3], %s832_s11 }
  0x42   : > { %s1560_s10 = smov (%p30_p0, %s29_s10), 0  ;;  %s1409_s6 = scalar_lea.hbm %s1533_s0, %s833_s12 }
  0x43   : > { %s231_s9 = sshll.u32 %s222_s15, 4  ;;  %s37_s30 = ssub.s32 %s1246_s22, %s1560_s10  ;;  %s1413_s9 = int_to_ptr.vmem [resolvable:$true] %s231_s9 }
  0x44   : > { %p39_p11 = scmp.eq.s32.totalorder %s37_s30, 0  ;;  %s1420_s18 = scalar_lea.sflag [#allocation4], %s218_s8 }
  0x45   : > { %s1136_s29 = scalar_lea.hbm %s1409_s6, 128  ;;  %p1549_p3 = scmp.ne.s32.totalorder %s1548_s7, 0 }
  0x46   : > { %s1418_s17 = scalar_select %p39_p11, %s1238_s20, %s41_s25  }
  0x47   : > { %p1137_p13 = scmp.ne.s32.totalorder %s1409_s6, %s1136_s29  ;;  %p1138_p6 = pneg %p1549_p3 }
  0x48   : > { %s1141_s13 = scalar_lea.hbm %s1533_s0, 256  ;;  %p1142_p1 = scmp.lt.u32.totalorder %s1409_s6, %s1533_s0 }
  0x49   : > { %p1139_p8 = pnand %p1138_p6, %p1137_p13  ;;  %p1143_p2 = scmp.lt.u32.totalorder %s1141_s13, %s1136_s29 }
  0x4a   : > { %p1145_p5 = scmp.lt.u32.totalorder %s1136_s29, %s1409_s6 }
  0x4b   : > { %p1140_p12 = pneg %p1139_p8  ;;  %p1144_p4 = por %p1143_p2, %p1142_p1 }
  0x4d   : > { %p1146_p7 = por %p1145_p5, %p1144_p4 }
  0x4f   : > { %p1147_p9 = pnand %p1146_p7, %p1140_p12 }
  0x51   : > { %1150 = shalt.err (!%p1147_p9)
}
  0x52   : > { %s1151_s25 = scalar_lea.vmem %s1413_s9, 128  ;;  %s1256_s8 = smov [#allocation3]  }
  0x53   : > { %p1152_p10 = scmp.ne.s32.totalorder %s1413_s9, %s1151_s25  ;;  %s1156_s30 = sshll.u32 %s1256_s8, 4  ;;  %s1157_s30 = int_to_ptr.vmem [resolvable:$false] %s1156_s30 }
  0x54   : > { %s1158_s11 = scalar_lea.vmem %s1157_s30, 256  ;;  %p1159_p13 = scmp.lt.s32.totalorder %s1413_s9, %s1157_s30 }
  0x55   : > { %p1154_p0 = pnand %p1152_p10, %p1138_p6  ;;  %p1160_p8 = scmp.lt.s32.totalorder %s1158_s11, %s1151_s25 }
  0x57   : > { %p1155_p11 = pneg %p1154_p0  ;;  %p1161_p1 = por %p1160_p8, %p1159_p13 }
  0x59   : > { %p1162_p2 = pnand %p1161_p1, %p1155_p11 }
  0x5b   : > { %1165 = shalt.err (!%p1162_p2)
}
  0x5c   : > { %s1257_s29 = smov 64   ;;  %s1258_s12 = smov 4  }
  0x5d   : > { %1009 = dma.hbm_to_vmem [thread:$0]  (!%p1549_p3), %s1409_s6, 128, %s1413_s9, %s1420_s18, %s1254_s16, %s1257_s29, %s1258_s12  }
  0x5e   : > { %p1550_p6 = scmp.ne.s32.totalorder %s1546_s28, 0 }
  0x5f   : > { %s245_s13 = sand.u32 (!%p1550_p6), 1, %s1234_s19   ;;  %p1551_p12 = scmp.ne.s32.totalorder (!%p1550_p6), %s1545_s27, 0 }
  0x60   : > { %243 = sbr.rel (%p1550_p6) target bundleno = 1062 (0x426), region = 40  ;;  %s835_s14 = sshll.u32 (!%p1550_p6), %s245_s13, 3 }
  0x61   : > { %s246_s15 = scalar_lea.sflag (!%p1550_p6), [#allocation4], %s245_s13  ;;  %s249_s25 = scalar_lea.vmem (!%p1550_p6), [#allocation3], %s835_s14 }
  0x67   : > { %1217 = dma.done.wait (%p1551_p12), %s246_s15, 128  }
  0x68   : > { %1219 = vsyncadd (%p1551_p12), %s246_s15, 4294967168  ;;  %p1552_p4 = scmp.ne.s32.totalorder %s1544_s26, 0 }
  0x6a   : > { %1221 = dma.done.wait (%p1552_p4), [#allocation7], 8448  }
  0x6b   : > { %1223 = vsyncadd (%p1552_p4), [#allocation7], 4294958848  ;;  %p838_p3 = scmp.ne.s32.totalorder %s1242_s21, 0 }
  0x6c   : > { %vm284_vm0 = vcmask (!%p838_p3), 25600   ;;  %v1259_v0 = vmov (!%p838_p3), 0.0  }
  0x6d   : > { %283 = sbr.rel (%p838_p3) target bundleno = 116 (0x74), region = 56  ;;  %285 = vst.msk [vmem:[#allocation2] sm:$0x3] (!%p838_p3), %vm284_vm0, %v1259_v0 }
  0x74 PF: > { %v286_v1 = vld [vmem:[%s249_s25] sm:$0xf]  ;;  %vm289_vm1 = vcmask 1043456   ;;  %v287_v2 = vld [vmem:[%s249_s25 + $0x4] sm:$0xf]  ;;  %v298_v5 = vlaneseq  ;;  %vm308_vm2 = vcmask 1041409  }
  0x75   : > { %v290_v3 = vsel %vm289_vm1, %v286_v1, 0.0  ;;  %v293_v4 = vsel %vm289_vm1, %v287_v2, 0.0  ;;  %v288_v12 = vld [vmem:[#allocation2] sm:$0x3]  ;;  %vm312_vm3 = vcmask 25600   ;;  %p839_p5 = scmp.ne.s32.totalorder %s1242_s21, 1 }
  0x76   : > { %291 = vadd.xlane.f32.xlu0 %v290_v3  ;;  %v1463_v6 = vand.u32 127, %v298_v5  ;;  %v1465_v7 = vshrl.u32 %v298_v5, 7  ;;  %v320_v16 = vld [vmem:[#allocation6] sm:$0xff] (!%p839_p5)  ;;  %v321_v17 = vld [vmem:[#allocation6 + $0x8] sm:$0xff] (!%p839_p5)  ;;  %v1260_v21 = vmov (!%p839_p5), 0.0   ;;  %v522_v23 = vld [vmem:[#allocation8 + $0x80] sm:$0xff] (!%p839_p5) }
  0x77   : > { %v346_v19 = vcombine.high (!%p839_p5), %v320_v16, %v320_v16  ;;  %v347_v20 = vcombine.high (!%p839_p5), %v321_v17, %v321_v17  ;;  %424 = vmatprep.mubr.f32.mxu0 (!%p839_p5), %v1260_v21  ;;  %495 = vmatprep.mubr.f32.mxu1 (!%p839_p5), %v1260_v21  ;;  %v523_v24 = vld [vmem:[#allocation8 + $0x88] sm:$0xff] (!%p839_p5)  ;;  %v554_v25 = vld [vmem:[#allocation8 + $0x180] sm:$0xff] (!%p839_p5)  ;;  %vm348_vm4 = vcmask (!%p839_p5), 31744   ;;  %v524_v34 = vld [vmem:[#allocation8 + $0x90] sm:$0xff] (!%p839_p5)  ;;  %vm722_vm7 = vcmask (!%p839_p5), 1041408  }
  0x78   : > { %v302_v9 = vsub.s32 %v1463_v6, %v1465_v7  ;;  %v921_v26 = vpack.c.bf16 (!%p839_p5), %v523_v24, %v522_v23  ;;  %v555_v27 = vld [vmem:[#allocation8 + $0x188] sm:$0xff] (!%p839_p5)  ;;  %v506_v28 = vld [vmem:[#allocation8] sm:$0xff] (!%p839_p5)  ;;  %v525_v36 = vld [vmem:[#allocation8 + $0x98] sm:$0xff] (!%p839_p5)  ;;  %vm720_vm6 = vcmp.lt.s32.totalorder (!%p839_p5), %v1463_v6, 27 }
  0x79   : > { %v507_v29 = vld [vmem:[#allocation8 + $0x8] sm:$0xff] (!%p839_p5)  ;;  %840 = vmatprep.subr.msk.mxu0 (!%p839_p5), %vm289_vm1, %v346_v19  ;;  %843 = vmatprep.subr.msk.mxu1 (!%p839_p5), %vm289_vm1, %v347_v20  ;;  %v953_v30 = vpack.c.bf16 (!%p839_p5), %v555_v27, %v554_v25  ;;  %v538_v32 = vld [vmem:[#allocation8 + $0x100] sm:$0xff] (!%p839_p5)  ;;  %v556_v37 = vld [vmem:[#allocation8 + $0x190] sm:$0xff] (!%p839_p5)  ;;  %v925_v39 = vpack.c.bf16 (!%p839_p5), %v525_v36, %v524_v34 }
  0x7a   : > { %294 = vadd.xlane.f32.xlu0 %v293_v4  ;;  %v923_v31 = vpack.c.bf16 (!%p839_p5), %v507_v29, %v506_v28  ;;  %v539_v33 = vld [vmem:[#allocation8 + $0x108] sm:$0xff] (!%p839_p5)  ;;  %841 = vmatpush1.msk.msra.mxu0 (!%p839_p5), %vm289_vm1, %v320_v16  ;;  %v557_v38 = vld [vmem:[#allocation8 + $0x198] sm:$0xff] (!%p839_p5)  ;;  %v508_v41 = vld [vmem:[#allocation8 + $0x10] sm:$0xff] (!%p839_p5) }
  0x7b   : > { %844 = vmatpush1.msk.msra.mxu1 (!%p839_p5), %vm289_vm1, %v321_v17  ;;  %v955_v35 = vpack.c.bf16 (!%p839_p5), %v539_v33, %v538_v32  ;;  %v957_v40 = vpack.c.bf16 (!%p839_p5), %v557_v38, %v556_v37  ;;  %v509_v42 = vld [vmem:[#allocation8 + $0x18] sm:$0xff] (!%p839_p5)  ;;  %v540_v43 = vld [vmem:[#allocation8 + $0x110] sm:$0xff] (!%p839_p5)  ;;  %922 = vmatprep.subr.bf16.mxu0 (!%p839_p5), %v921_v26  ;;  %v526_v45 = vld [vmem:[#allocation8 + $0xa0] sm:$0xff] (!%p839_p5) }
  0x7c   : > { %954 = vmatprep.subr.bf16.mxu1 (!%p839_p5), %v953_v30  ;;  %v541_v44 = vld [vmem:[#allocation8 + $0x118] sm:$0xff] (!%p839_p5)  ;;  %v527_v46 = vld [vmem:[#allocation8 + $0xa8] sm:$0xff] (!%p839_p5)  ;;  %v927_v47 = vpack.c.bf16 (!%p839_p5), %v509_v42, %v508_v41  ;;  %v558_v49 = vld [vmem:[#allocation8 + $0x1a0] sm:$0xff] (!%p839_p5) }
  0x7d   : > { %v959_v48 = vpack.c.bf16 (!%p839_p5), %v541_v44, %v540_v43  ;;  %v559_v50 = vld [vmem:[#allocation8 + $0x1a8] sm:$0xff] (!%p839_p5)  ;;  %v510_v51 = vld [vmem:[#allocation8 + $0x20] sm:$0xff] (!%p839_p5)  ;;  %v929_v52 = vpack.c.bf16 (!%p839_p5), %v527_v46, %v526_v45  ;;  %v528_v57 = vld [vmem:[#allocation8 + $0xb0] sm:$0xff] (!%p839_p5) }
  0x7e   : > { %v961_v53 = vpack.c.bf16 (!%p839_p5), %v559_v50, %v558_v49  ;;  %v511_v54 = vld [vmem:[#allocation8 + $0x28] sm:$0xff] (!%p839_p5)  ;;  %v542_v55 = vld [vmem:[#allocation8 + $0x120] sm:$0xff] (!%p839_p5)  ;;  %v529_v58 = vld [vmem:[#allocation8 + $0xb8] sm:$0xff] (!%p839_p5) }
  0x7f   : > { %v543_v56 = vld [vmem:[#allocation8 + $0x128] sm:$0xff] (!%p839_p5)  ;;  %v560_v59 = vld [vmem:[#allocation8 + $0x1b0] sm:$0xff] (!%p839_p5)  ;;  %v561_v60 = vld [vmem:[#allocation8 + $0x1b8] sm:$0xff] (!%p839_p5)  ;;  %v931_v61 = vpack.c.bf16 (!%p839_p5), %v511_v54, %v510_v51  ;;  %v933_v1 = vpack.c.bf16 (!%p839_p5), %v529_v58, %v528_v57  ;;  %v326_v57 = vsub.s32 (!%p839_p5), 0, %v1465_v7  ;;  %v334_v58 = vsub.s32 (!%p839_p5), 2, %v1465_v7 }
  0x80   : > { %v963_v62 = vpack.c.bf16 (!%p839_p5), %v543_v56, %v542_v55  ;;  %v512_v63 = vld [vmem:[#allocation8 + $0x30] sm:$0xff] (!%p839_p5)  ;;  %v513_v0 = vld [vmem:[#allocation8 + $0x38] sm:$0xff] (!%p839_p5)  ;;  %v965_v2 = vpack.c.bf16 (!%p839_p5), %v561_v60, %v560_v59  ;;  %v530_v5 = vld [vmem:[#allocation8 + $0xc0] sm:$0xff] (!%p839_p5)  ;;  %v330_v60 = vsub.s32 (!%p839_p5), 1, %v1465_v7 }
  0x81   : > { %v544_v3 = vld [vmem:[#allocation8 + $0x130] sm:$0xff] (!%p839_p5)  ;;  %v545_v4 = vld [vmem:[#allocation8 + $0x138] sm:$0xff] (!%p839_p5)  ;;  %v546_v17 = vld [vmem:[#allocation8 + $0x140] sm:$0xff] (!%p839_p5) }
  0x82   : > { %v532_v19 = vld [vmem:[#allocation8 + $0xd0] sm:$0xff] (!%p839_p5)  ;;  %v533_v20 = vld [vmem:[#allocation8 + $0xd8] sm:$0xff] (!%p839_p5)  ;;  %v535_v32 = vld [vmem:[#allocation8 + $0xe8] sm:$0xff] (!%p839_p5) }
  0x83   : > { %v564_v21 = vld [vmem:[#allocation8 + $0x1d0] sm:$0xff] (!%p839_p5)  ;;  %v517_v26 = vld [vmem:[#allocation8 + $0x58] sm:$0xff] (!%p839_p5)  ;;  %v941_v27 = vpack.c.bf16 (!%p839_p5), %v533_v20, %v532_v19  ;;  %v566_v33 = vld [vmem:[#allocation8 + $0x1e0] sm:$0xff] (!%p839_p5) }
  0x84   : > { %v516_v25 = vld [vmem:[#allocation8 + $0x50] sm:$0xff] (!%p839_p5)  ;;  %v549_v30 = vld [vmem:[#allocation8 + $0x158] sm:$0xff] (!%p839_p5)  ;;  %v567_v34 = vld [vmem:[#allocation8 + $0x1e8] sm:$0xff] (!%p839_p5) }
  0x85   : > { %v548_v29 = vld [vmem:[#allocation8 + $0x150] sm:$0xff] (!%p839_p5)  ;;  %v977_v38 = vpack.c.bf16 (!%p839_p5), %v567_v34, %v566_v33  ;;  %v550_v41 = vld [vmem:[#allocation8 + $0x160] sm:$0xff] (!%p839_p5)  ;;  %v551_v43 = vld [vmem:[#allocation8 + $0x168] sm:$0xff] (!%p839_p5) }
  0x86   : > { %v975_v36 = vpack.c.bf16 (!%p839_p5), %v549_v30, %v548_v29  ;;  %v979_v44 = vpack.c.bf16 (!%p839_p5), %v551_v43, %v550_v41  ;;  %v536_v45 = vld [vmem:[#allocation8 + $0xf0] sm:$0xff] (!%p839_p5)  ;;  %v537_v46 = vld [vmem:[#allocation8 + $0xf8] sm:$0xff] (!%p839_p5) }
  0x87   : > { %v569_v49 = vld [vmem:[#allocation8 + $0x1f8] sm:$0xff] (!%p839_p5)  ;;  %v520_v50 = vld [vmem:[#allocation8 + $0x70] sm:$0xff] (!%p839_p5) }
  0x88   : > { %v521_v51 = vld [vmem:[#allocation8 + $0x78] sm:$0xff] (!%p839_p5)  ;;  %v552_v54 = vld [vmem:[#allocation8 + $0x170] sm:$0xff] (!%p839_p5) }
  0x89   : > { %v553_v55 = vld [vmem:[#allocation8 + $0x178] sm:$0xff] (!%p839_p5) }
  0x8a   : > { %v983_v56 = vpack.c.bf16 (!%p839_p5), %v553_v55, %v552_v54  ;;  %v322_v59 = vld [vmem:[%s1535_s2] sm:$0xf] (!%p839_p5) }
 0x103   : > { %v292_v8 = vpop.xlane.xlu0 %291 }
 0x104   : > { %v303_v11 = vrot.slane %v292_v8, %v302_v9  ;;  %v531_v8 = vld [vmem:[#allocation8 + $0xc8] sm:$0xff] (!%p839_p5) }
 0x107   : > { %v295_v10 = vpop.xlane.xlu0 %294  ;;  %317 = sbr.rel (%p839_p5) target bundleno = 1037 (0x40d), region = 60 }
 0x108   : > { %v307_v13 = vrot.slane %v295_v10, %v302_v9  ;;  %v562_v9 = vld [vmem:[#allocation8 + $0x1c0] sm:$0xff] (!%p839_p5)  ;;  %v563_v10 = vld [vmem:[#allocation8 + $0x1c8] sm:$0xff] (!%p839_p5) }
 0x109   : > { %v969_v16 = vpack.c.bf16 (!%p839_p5), %v563_v10, %v562_v9 }
 0x10a   : > { %v309_v14 = vsel %vm308_vm2, %v307_v13, %v303_v11  ;;  %v935_v11 = vpack.c.bf16 (!%p839_p5), %v513_v0, %v512_v63  ;;  %v514_v13 = vld [vmem:[#allocation8 + $0x40] sm:$0xff] (!%p839_p5)  ;;  %v335_v63 = vrot.slane (!%p839_p5), %v322_v59, %v334_v58  ;;  %v331_v0 = vrot.slane (!%p839_p5), %v322_v59, %v330_v60 }
 0x10b   : > { %v311_v15 = vadd.f32 %v309_v14, %v288_v12  ;;  %v967_v12 = vpack.c.bf16 (!%p839_p5), %v545_v4, %v544_v3  ;;  %v515_v14 = vld [vmem:[#allocation8 + $0x48] sm:$0xff] (!%p839_p5) }
 0x10c   : > { %v939_v23 = vpack.c.bf16 (!%p839_p5), %v515_v14, %v514_v13 }
 0x10d   : > { %313 = vst.msk [vmem:[#allocation2] sm:$0x3] %vm312_vm3, %v311_v15  ;;  %v937_v15 = vpack.c.bf16 (!%p839_p5), %v531_v8, %v530_v5 }
 0x114   : > { %v318_v18 = vld [vmem:[#allocation2] sm:$0x3] }
 0x115   : > { %v319_v22 = vmul.f32 0.00390625, %v318_v18  ;;  %v547_v18 = vld [vmem:[#allocation8 + $0x148] sm:$0xff] }
 0x116   : > { %v971_v24 = vpack.c.bf16 %v547_v18, %v546_v17  ;;  %v846_v17 = vld [vmem:[%s1537_s4] ss:$0 sm:$0xff] }
 0x117   : > { %842 = vmatmul.mubr.msk.f32.vlgmr.msra.gmra.mrb[0].mxu0 %vm348_vm4, %v319_v22  ;;  %845 = vmatmul.mubr.msk.f32.vlgmr.msra.gmra.mrb[0].mxu1 %vm348_vm4, %v319_v22  ;;  %v565_v22 = vld [vmem:[#allocation8 + $0x1d8] sm:$0xff] }
 0x118   : > { %924 = vmatpush3.bf16.msra.mxu0 %v923_v31  ;;  %956 = vmatpush3.bf16.msra.mxu1 %v955_v35  ;;  %v973_v28 = vpack.c.bf16 %v565_v22, %v564_v21  ;;  %v534_v31 = vld [vmem:[#allocation8 + $0xe0] sm:$0xff]  ;;  %v943_v35 = vpack.c.bf16 %v517_v26, %v516_v25 }
 0x119   : > { %926 = vmatprep.subr.bf16.mxu0 %v925_v39  ;;  %958 = vmatprep.subr.bf16.mxu1 %v957_v40  ;;  %v945_v37 = vpack.c.bf16 %v535_v32, %v534_v31  ;;  %v518_v39 = vld [vmem:[#allocation8 + $0x60] sm:$0xff]  ;;  %v519_v40 = vld [vmem:[#allocation8 + $0x68] sm:$0xff] }
 0x11a   : > { %v947_v42 = vpack.c.bf16 %v519_v40, %v518_v39 }
 0x11c   : > { %928 = vmatpush3.bf16.msra.mxu0 %v927_v47  ;;  %960 = vmatpush3.bf16.msra.mxu1 %v959_v48  ;;  %v568_v47 = vld [vmem:[#allocation8 + $0x1f0] sm:$0xff]  ;;  %v949_v48 = vpack.c.bf16 %v537_v46, %v536_v45 }
 0x11d   : > { %930 = vmatprep.subr.bf16.mxu0 %v929_v52  ;;  %962 = vmatprep.subr.bf16.mxu1 %v961_v53  ;;  %v981_v52 = vpack.c.bf16 %v569_v49, %v568_v47  ;;  %v951_v53 = vpack.c.bf16 %v521_v51, %v520_v50 }
 0x120   : > { %932 = vmatpush3.bf16.msra.mxu0 %v931_v61  ;;  %964 = vmatpush3.bf16.msra.mxu1 %v963_v62  ;;  %v338_v61 = vsub.s32 3, %v1465_v7  ;;  %v327_v62 = vrot.slane %v322_v59, %v326_v57 }
 0x121   : > { %934 = vmatprep.subr.bf16.mxu0 %v933_v1  ;;  %966 = vmatprep.subr.bf16.mxu1 %v965_v2 }
 0x122   : > { %v339_v1 = vrot.slane %v322_v59, %v338_v61 }
 0x124   : > { %936 = vmatpush3.bf16.msra.mxu0 %v935_v11  ;;  %968 = vmatpush3.bf16.msra.mxu1 %v967_v12 }
 0x125   : > { %938 = vmatprep.subr.bf16.mxu0 %v937_v15  ;;  %970 = vmatprep.subr.bf16.mxu1 %v969_v16 }
 0x128   : > { %940 = vmatpush3.bf16.msra.mxu0 %v939_v23  ;;  %972 = vmatpush3.bf16.msra.mxu1 %v971_v24 }
 0x129   : > { %942 = vmatprep.subr.bf16.mxu0 %v941_v27  ;;  %974 = vmatprep.subr.bf16.mxu1 %v973_v28 }
 0x12c   : > { %944 = vmatpush3.bf16.msra.mxu0 %v943_v35  ;;  %976 = vmatpush3.bf16.msra.mxu1 %v975_v36 }
 0x12d   : > { %946 = vmatprep.subr.bf16.mxu0 %v945_v37  ;;  %978 = vmatprep.subr.bf16.mxu1 %v977_v38 }
 0x130   : > { %948 = vmatpush3.bf16.msra.mxu0 %v947_v42  ;;  %980 = vmatpush3.bf16.msra.mxu1 %v979_v44 }
 0x131   : > { %950 = vmatprep.subr.bf16.mxu0 %v949_v48  ;;  %982 = vmatprep.subr.bf16.mxu1 %v981_v52 }
 0x134   : > { %952 = vmatpush3.bf16.msra.mxu0 %v951_v53  ;;  %984 = vmatpush3.bf16.msra.mxu1 %v983_v56 }
 0x1ea   : > { %v426_v2 = vpop.f32.mrb[0].mxu0  ;;  %v497_v3 = vpop.f32.mrb[0].mxu1 }
 0x1eb   : > { %v427_v4 = vadd.f32 %v426_v2, %v327_v62  ;;  %v498_v5 = vadd.f32 %v497_v3, %v335_v63  ;;  %v428_v8 = vpop.f32.mrb[1].mxu0  ;;  %v499_v9 = vpop.f32.mrb[1].mxu1 }
 0x1ec   : > { %v429_v10 = vadd.f32 %v428_v8, %v331_v0  ;;  %v500_v11 = vadd.f32 %v499_v9, %v339_v1 }
 0x1ed   : > { %v504_v12 = vmax.f32 %v498_v5, 0.0  ;;  %v502_v15 = vmax.f32 %v427_v4, 0.0 }
 0x1ee   : > { %v503_v13 = vmax.f32 %v429_v10, 0.0  ;;  %v505_v14 = vmax.f32 %v500_v11, 0.0 }
 0x1f0   : > { %641 = vmatprep.mubr.f32.mxu0 %v503_v13  ;;  %711 = vmatprep.mubr.f32.mxu1 %v505_v14 }
 0x1f1   : > { %642 = vmatmul.mubr.f32.vlgmr.msra.gmra.mrb[2].mxu0 %v502_v15  ;;  %712 = vmatmul.mubr.f32.vlgmr.msra.gmra.mrb[2].mxu1 %v504_v12 }
 0x2c4   : > { %v883_v7 = vpop.f32.mrb[2].mxu0  ;;  %v918_v16 = vpop.f32.mrb[2].mxu1 }
 0x2c5   : > { %v884_v18 = vpop.f32.mrb[3].mxu0  ;;  %v919_v19 = vpop.f32.mrb[3].mxu1 }
 0x2c6   : > { %v885_v20 = vadd.f32 %v884_v18, %v883_v7  ;;  %v920_v21 = vadd.f32 %v919_v19, %v918_v16 }
 0x2c8   : > { %v644_v22 = vadd.f32 %v885_v20, %v846_v17 }
 0x2ca   : > { %v714_v23 = vadd.f32 %v920_v21, %v644_v22 }
 0x2cc   : > { %vm717_vm5 = vcmp.gt.f32.partialorder %v714_v23, 0.0  ;;  %v718_v24 = vmul.f32 0.01, %v714_v23 }
 0x2ce   : > { %v719_v25 = vsel %vm717_vm5, %v714_v23, %v718_v24 }
 0x2cf   : > { %v721_v26 = vsel %vm720_vm6, %v719_v25, -1e+30 }
 0x2d0   : > { %v723_v27 = vsel %vm722_vm7, %v721_v26, -inf }
 0x2d1   : > { %724 = vmax.xlane.f32.xlu0 %v723_v27 }
 0x35e   : > { %v725_v28 = vpop.xlane.xlu0 %724 }
 0x35f   : > { %v726_v29 = vsub.f32 %v721_v26, %v725_v28 }
 0x361   : > { %v727_v30 = vmul.f32 1.442695, %v726_v29 }
 0x363   : > { %1076 = vpow2.f32 %v727_v30 }
 0x36d   : > { %v1077_v31 = vpop.eup %1076 }
 0x36e   : > { %v729_v32 = vsel %vm722_vm7, %v1077_v31, 0.0 }
 0x36f   : > { %730 = vadd.xlane.f32.xlu0 %v729_v32 }
 0x3fc   : > { %v731_v33 = vpop.xlane.xlu0 %730 }
 0x3fd   : > { %1078 = vlog2.f32 %v731_v33 }
 0x407   : > { %v1079_v34 = vpop.eup %1078 }
 0x408   : > { %v733_v35 = vmul.f32 0.6931472, %v1079_v34 }
 0x40a   : > { %v734_v36 = vsub.f32 %v726_v29, %v733_v35 }
 0x40c   : > { %735 = vst [vmem:[#allocation9] sm:$0x3] %v734_v36 }
 0x40d PF: > { %p1489_p7 = scmp.eq.s32.totalorder %s827_s24, 1  ;;  %s1261_s16 = smov [#allocation9]  }
 0x40e   : > { %s745_s6 = sshll.u32 %s1261_s16, 4  ;;  %s746_s6 = int_to_ptr.vmem [resolvable:$true] %s745_s6 }
 0x40f   : > { %s1166_s9 = scalar_lea.vmem %s746_s6, 32  ;;  %p1173_p11 = scmp.lt.s32.totalorder %s746_s6, %s746_s6 }
 0x410   : > { %p1167_p9 = scmp.ne.s32.totalorder %s746_s6, %s1166_s9  ;;  %p1174_p13 = scmp.lt.s32.totalorder %s1166_s9, %s1166_s9 }
 0x412   : > { %p1168_p10 = pnand %p1167_p9, %p1489_p7  ;;  %p1175_p8 = por %p1174_p13, %p1173_p11 }
 0x414   : > { %p1169_p0 = pneg %p1168_p10 }
 0x416   : > { %p1176_p1 = pnand %p1175_p8, %p1169_p0 }
 0x418   : > { %1179 = shalt.err (!%p1176_p1)
}
 0x419   : > { %s1180_s24 = scalar_lea.hbm %s1538_s5, 32 }
 0x41a   : > { %p1181_p2 = scmp.ne.s32.totalorder %s1538_s5, %s1180_s24  ;;  %p1186_p4 = scmp.lt.u32.totalorder %s1180_s24, %s1538_s5 }
 0x41c   : > { %p1182_p6 = pnand %p1181_p2, %p1489_p7 }
 0x41e   : > { %p1183_p12 = pneg %p1182_p6 }
 0x420   : > { %p1188_p3 = pnand %p1186_p4, %p1183_p12 }
 0x422   : > { %1191 = shalt.err (!%p1188_p3)
}
 0x423   : > { %996 = dma.vmem_to_hbm [thread:$0]  (%p1489_p7), %s746_s6, 32, %s1538_s5, [#allocation5]  }
 0x424   : > { %1225 = dma.done.wait (%p1489_p7), [#allocation5], 32  }
 0x425   : > { %1227 = vsyncadd (%p1489_p7), [#allocation5], 4294967264 }
 0x426 PF: > { %s20_s23 = sadd.s32 1, %s1250_s23   ;;  %s1554_s18 = smov %s1234_s19 }
 0x427   : > { %p17_p5 = scmp.ge.s32.totalorder %s20_s23, 4   ;;  %s1555_s19 = smov %s1238_s20 }
 0x428   : > { %s1556_s20 = smov %s1418_s17  ;;  %s1557_s21 = smov %s1246_s22 }
 0x429   : > { %s1558_s22 = smov %s1560_s10  ;;  %19 = sbr.rel (!%p17_p5) target bundleno = 6 (0x6), region = 94 }
 0x430   :  { %758 = vsyncpa [#allocation4], 1 }
 0x431   :  { %760 = vsyncpa [#allocation4 + $0x1], 1 }
 0x432   :  { %761 = vsyncpa [#allocation7], 1 }
 0x433   :  { %762 = vsyncpa [#allocation5], 1 }
 0x434   :  { %764 = vsyncpa [#allocation5 + $0x1], 1 }

</bundles_post_ra>
